<compile_context>
chip_gen: v7x
topology: tpu7x:2x2x1
jax: 0.10.0
libtpu: 0.0.40
codegen_flags: <defaults>
</compile_context>

<pallas_src>
import jax
import jax.numpy as jnp
from jax import lax
from jax.experimental import pallas as pl
from jax.experimental.pallas import tpu as pltpu

EPS = 1e-5  # torch.nn.LayerNorm default eps
H = 768     # BERT / HuBERT hidden size


def head_kernel(bert_ref, pack_ref, w1_ref, out_ref):
    """
    bert_ref : (4, 768)   pooled BERT output
    pack_ref : (8, 768)   packed parameters:
                 rows 0-3            : g_lo = ln1_gamma[:, :768]
                 rows 4-7, lanes  0-31: G_all = ln1_g @ w1
                 rows 4-7, lanes 32-63: C_all = ln1_b @ w1 + b1
                 rows 4-7, lanes 64-95: g2w2  = ln2_g * w2^T
                 rows 4-7, lane  96   : S_g   = rowsum(g2w2)
                 rows 4-7, lane  97   : c2    = rowsum(ln2_b * w2^T) + b2
    w1_ref   : (768, 32)  w1[:768, :]  (the live half of Linear(1536, 32))
    out_ref  : (4, 128)   result broadcast across lanes (sliced to (4,1) outside)
    """
    bert = bert_ref[...]                           # (4, 768) f32
    g_lo = pack_ref[0:4, :]                        # (4, 768)

    # ---- MXU contraction starts immediately (input-only dependence) ---------
    p = jnp.dot(bert * g_lo, w1_ref[...],
                preferred_element_type=jnp.float32)          # (4, 32)

    # ---- LayerNorm([4, 1536]) statistics, one-pass, bert only ---------------
    # concat = [bert, zeros]; zeros contribute 0 to both sums but count in N.
    n1 = bert.shape[0] * 2 * bert.shape[1]                   # 4 * 1536
    inv_n1 = 1.0 / n1
    s1 = jnp.sum(bert)                                       # independent reduces
    q1 = jnp.sum(bert * bert)
    mu1 = s1 * inv_n1
    var1 = q1 * inv_n1 - mu1 * mu1
    inv_std1 = lax.rsqrt(var1 + EPS)

    # ---- Linear(1536, 32) with LN1-affine + zero-half folded into constants -
    G_all = pack_ref[4:8, 0:32]                              # (4, 32)
    C_all = pack_ref[4:8, 32:64]                             # (4, 32)
    h = inv_std1 * p - (mu1 * inv_std1) * G_all + C_all      # (4, 32)

    # ---- ReLU (dropout == identity at inference) -----------------------------
    h = jnp.maximum(h, 0.0)

    # ---- LayerNorm([4, 32]) one-pass stats + folded affine/Linear(32,1) -----
    n2 = h.shape[0] * h.shape[1]                             # 128
    inv_n2 = 1.0 / n2
    s2 = jnp.sum(h)
    q2 = jnp.sum(h * h)
    g2w2 = pack_ref[4:8, 64:96]                              # (4, 32)
    r = jnp.sum(h * g2w2, axis=-1, keepdims=True)            # (4, 1)
    mu2 = s2 * inv_n2
    var2 = q2 * inv_n2 - mu2 * mu2
    inv_std2 = lax.rsqrt(var2 + EPS)
    S_g = pack_ref[4:8, 96:97]                               # (4, 1)
    c2 = pack_ref[4:8, 97:98]                                # (4, 1)
    y = inv_std2 * (r - mu2 * S_g) + c2                      # (4, 1)

    # ---- tanh * 2.5, lane-dense store ----------------------------------------
    out_ref[...] = jnp.broadcast_to(jnp.tanh(y) * 2.5, out_ref.shape)


def pack_params(params):
    """Data-independent parameter packing. Call ONCE at param load, not per step."""
    g, b = params["ln1_g"], params["ln1_b"]                  # (4, 1536)
    w1, b1 = params["w1"], params["b1"]                      # (1536, 32), (1, 32)
    g2, b2_ln = params["ln2_g"], params["ln2_b"]             # (4, 32)
    w2 = params["w2"][:, 0]                                  # (32,)
    b2 = params["b2"][0, 0]                                  # scalar

    G_all = g @ w1                                           # (4, 32)
    C_all = b @ w1 + b1                                      # (4, 32)
    g2w2 = g2 * w2[None, :]                                  # (4, 32)
    S_g = jnp.sum(g2w2, axis=-1, keepdims=True)              # (4, 1)
    c2 = jnp.sum(b2_ln * w2[None, :], axis=-1, keepdims=True) + b2  # (4, 1)

    small = jnp.zeros((4, H), jnp.float32)
    small = small.at[:, 0:32].set(G_all)
    small = small.at[:, 32:64].set(C_all)
    small = small.at[:, 64:96].set(g2w2)
    small = small.at[:, 96:97].set(S_g)
    small = small.at[:, 97:98].set(c2)

    pack = jnp.concatenate([g[:, :H], small], axis=0)        # (8, 768)
    w1_lo = w1[:H, :]                                        # (768, 32)
    return pack, w1_lo


@jax.jit
def pooled_audio_head(bert_pooled, hubert_hidden, packed):
    # hubert_hidden is accepted for parity with the reference forward, but its
    # mean-pool is discarded (replaced with zeros) in the reference, so it is
    # never passed to the kernel: no DMA, no reduce.
    del hubert_hidden
    pack, w1_lo = packed
    B, D = bert_pooled.shape
    assert B == 4 and D == H, "module hard-codes nn.LayerNorm([4, 768*2])"
    vmem = pl.BlockSpec(memory_space=pltpu.MemorySpace.VMEM)
    out = pl.pallas_call(
        head_kernel,
        out_shape=jax.ShapeDtypeStruct((B, 128), jnp.float32),
        in_specs=[vmem, vmem, vmem],
        out_specs=vmem,
    )(bert_pooled, pack, w1_lo)
    return out[:, :1]


def init_params(key):
    """Deterministic synthetic parameters matching the module __init__ shapes."""
    D = 2 * H
    k1, k2, k3, k4, k5, k6 = jax.random.split(key, 6)
    return {
        # nn.LayerNorm([4, 768*2])
        "ln1_g": 1.0 + 0.01 * jax.random.normal(k1, (4, D), jnp.float32),
        "ln1_b": 0.01 * jax.random.normal(k2, (4, D), jnp.float32),
        # nn.Linear(1536, 32)
        "w1": 0.02 * jax.random.normal(k3, (D, 32), jnp.float32),
        "b1": jnp.zeros((1, 32), jnp.float32),
        # nn.LayerNorm([4, 32])
        "ln2_g": 1.0 + 0.01 * jax.random.normal(k4, (4, 32), jnp.float32),
        "ln2_b": 0.01 * jax.random.normal(k5, (4, 32), jnp.float32),
        # nn.Linear(32, 1)
        "w2": 0.02 * jax.random.normal(k6, (32, 1), jnp.float32),
        "b2": jnp.zeros((1, 1), jnp.float32),
    }


def reference_head(bert_pooled, hubert_hidden, params):
    """Pure-JAX transcription of the original forward (post-backbone)."""
    pooled_hubert = jnp.mean(hubert_hidden, axis=1)
    concat = jnp.concatenate([bert_pooled, jnp.zeros_like(pooled_hubert)], axis=1)
    mu = jnp.mean(concat)
    var = jnp.mean((concat - mu) ** 2)
    x = (concat - mu) / jnp.sqrt(var + EPS) * params["ln1_g"] + params["ln1_b"]
    h = x @ params["w1"] + params["b1"]
    h = jnp.maximum(h, 0.0)
    mu2 = jnp.mean(h)
    var2 = jnp.mean((h - mu2) ** 2)
    h = (h - mu2) / jnp.sqrt(var2 + EPS) * params["ln2_g"] + params["ln2_b"]
    y = h @ params["w2"] + params["b2"]
    return jnp.tanh(y) * 2.5


if __name__ == "__main__":
    key = jax.random.PRNGKey(0)
    k_params, k_bert, k_hub = jax.random.split(key, 3)

    B = 4      # fixed by nn.LayerNorm([4, 768*2])
    T = 16     # small synthetic HuBERT sequence length

    params = init_params(k_params)
    packed = jax.block_until_ready(pack_params(params))  # hoisted: done once

    # Synthetic stand-ins for the backbone outputs.
    bert_pooled = jax.random.normal(k_bert, (B, H), jnp.float32)       # pooled_output_bert
    hubert_hidden = jax.random.normal(k_hub, (B, T, H), jnp.float32)   # hubert hidden states

    out = pooled_audio_head(bert_pooled, hubert_hidden, packed)
    out = jax.block_until_ready(out)

    assert out.shape == (B, 1) and out.dtype == jnp.float32
    # tanh(.) * 2.5 must land in [-2.5, 2.5]
    assert bool(jnp.all(jnp.abs(out) <= 2.5))

    # Correctness vs. the straightforward JAX transcription of the module.
    ref = jax.block_until_ready(reference_head(bert_pooled, hubert_hidden, params))
    max_err = float(jnp.max(jnp.abs(out - ref)))
    assert max_err < 1e-3, f"mismatch vs reference: {max_err}"

    print("KERNEL_OK")
</pallas_src>

<mosaic_0001>
module attributes {stable_mosaic.version = 11 : i64} {
  func.func @head_kernel(%arg0: memref<4x768xf32, #tpu.memory_space<vmem>>, %arg1: memref<8x768xf32, #tpu.memory_space<vmem>>, %arg2: memref<768x32xf32, #tpu.memory_space<vmem>>, %arg3: memref<4x128xf32, #tpu.memory_space<vmem>>) attributes {dimension_semantics = [], scalar_prefetch = 0 : i64, scratch_operands = 0 : i64, tpu.core_type = #tpu.core_type<tc>} {
    %c0 = arith.constant 0 : index
    %c0_0 = arith.constant 0 : index
    %0 = vector.load %arg0[%c0, %c0_0] : memref<4x768xf32, #tpu.memory_space<vmem>>, vector<4x768xf32>
    %c0_1 = arith.constant 0 : index
    %c0_2 = arith.constant 0 : index
    %1 = vector.load %arg1[%c0_1, %c0_2] : memref<8x768xf32, #tpu.memory_space<vmem>>, vector<4x768xf32>
    %2 = arith.mulf %0, %1 : vector<4x768xf32>
    %c0_3 = arith.constant 0 : index
    %c0_4 = arith.constant 0 : index
    %3 = vector.load %arg2[%c0_3, %c0_4] : memref<768x32xf32, #tpu.memory_space<vmem>>, vector<768x32xf32>
    %cst = arith.constant dense<0.000000e+00> : vector<4x32xf32>
    %4 = tpu.matmul %2, %3, %cst {dimension_numbers = #tpu.dot_dimension_numbers<[1], [0], [0], [1], [0, 0, 1, 1], [], []>} : vector<4x768xf32>, vector<768x32xf32>, vector<4x32xf32> -> vector<4x32xf32>
    %5 = vector.shape_cast %0 : vector<4x768xf32> to vector<1x4x768xf32>
    %cst_5 = arith.constant dense<0.000000e+00> : vector<1xf32>
    %6 = vector.multi_reduction <add>, %5, %cst_5 [1, 2] : vector<1x4x768xf32> to vector<1xf32>
    %7 = vector.shape_cast %6 : vector<1xf32> to vector<1x1x1xf32>
    %8 = vector.extract %7[0, 0, 0] : f32 from vector<1x1x1xf32>
    %9 = arith.mulf %0, %0 : vector<4x768xf32>
    %10 = vector.shape_cast %9 : vector<4x768xf32> to vector<1x4x768xf32>
    %cst_6 = arith.constant dense<0.000000e+00> : vector<1xf32>
    %11 = vector.multi_reduction <add>, %10, %cst_6 [1, 2] : vector<1x4x768xf32> to vector<1xf32>
    %12 = vector.shape_cast %11 : vector<1xf32> to vector<1x1x1xf32>
    %13 = vector.extract %12[0, 0, 0] : f32 from vector<1x1x1xf32>
    %cst_7 = arith.constant 1.62760422E-4 : f32
    %14 = arith.mulf %8, %cst_7 : f32
    %cst_8 = arith.constant 1.62760422E-4 : f32
    %15 = arith.mulf %13, %cst_8 : f32
    %16 = arith.mulf %14, %14 : f32
    %17 = arith.subf %15, %16 : f32
    %cst_9 = arith.constant 9.99999974E-6 : f32
    %18 = arith.addf %17, %cst_9 : f32
    %19 = math.rsqrt %18 : f32
    %c4 = arith.constant 4 : index
    %c0_10 = arith.constant 0 : index
    %20 = vector.load %arg1[%c4, %c0_10] : memref<8x768xf32, #tpu.memory_space<vmem>>, vector<4x32xf32>
    %c4_11 = arith.constant 4 : index
    %c32 = arith.constant 32 : index
    %21 = vector.load %arg1[%c4_11, %c32] : memref<8x768xf32, #tpu.memory_space<vmem>>, vector<4x32xf32>
    %22 = vector.broadcast %19 : f32 to vector<4x32xf32>
    %23 = arith.mulf %22, %4 : vector<4x32xf32>
    %24 = arith.mulf %14, %19 : f32
    %25 = vector.broadcast %24 : f32 to vector<4x32xf32>
    %26 = arith.mulf %25, %20 : vector<4x32xf32>
    %27 = arith.subf %23, %26 : vector<4x32xf32>
    %28 = arith.addf %27, %21 : vector<4x32xf32>
    %cst_12 = arith.constant 0.000000e+00 : f32
    %29 = vector.broadcast %cst_12 : f32 to vector<4x32xf32>
    %30 = arith.maximumf %28, %29 : vector<4x32xf32>
    %31 = vector.shape_cast %30 : vector<4x32xf32> to vector<1x4x32xf32>
    %cst_13 = arith.constant dense<0.000000e+00> : vector<1xf32>
    %32 = vector.multi_reduction <add>, %31, %cst_13 [1, 2] : vector<1x4x32xf32> to vector<1xf32>
    %33 = vector.shape_cast %32 : vector<1xf32> to vector<1x1x1xf32>
    %34 = vector.extract %33[0, 0, 0] : f32 from vector<1x1x1xf32>
    %35 = arith.mulf %30, %30 : vector<4x32xf32>
    %36 = vector.shape_cast %35 : vector<4x32xf32> to vector<1x4x32xf32>
    %cst_14 = arith.constant dense<0.000000e+00> : vector<1xf32>
    %37 = vector.multi_reduction <add>, %36, %cst_14 [1, 2] : vector<1x4x32xf32> to vector<1xf32>
    %38 = vector.shape_cast %37 : vector<1xf32> to vector<1x1x1xf32>
    %39 = vector.extract %38[0, 0, 0] : f32 from vector<1x1x1xf32>
    %c4_15 = arith.constant 4 : index
    %c64 = arith.constant 64 : index
    %40 = vector.load %arg1[%c4_15, %c64] : memref<8x768xf32, #tpu.memory_space<vmem>>, vector<4x32xf32>
    %41 = arith.mulf %30, %40 : vector<4x32xf32>
    %cst_16 = arith.constant dense<0.000000e+00> : vector<4xf32>
    %42 = vector.multi_reduction <add>, %41, %cst_16 [1] : vector<4x32xf32> to vector<4xf32>
    %43 = vector.shape_cast %42 : vector<4xf32> to vector<4x1xf32>
    %cst_17 = arith.constant 7.812500e-03 : f32
    %44 = arith.mulf %34, %cst_17 : f32
    %cst_18 = arith.constant 7.812500e-03 : f32
    %45 = arith.mulf %39, %cst_18 : f32
    %46 = arith.mulf %44, %44 : f32
    %47 = arith.subf %45, %46 : f32
    %cst_19 = arith.constant 9.99999974E-6 : f32
    %48 = arith.addf %47, %cst_19 : f32
    %49 = math.rsqrt %48 : f32
    %c4_20 = arith.constant 4 : index
    %c96 = arith.constant 96 : index
    %50 = vector.load %arg1[%c4_20, %c96] : memref<8x768xf32, #tpu.memory_space<vmem>>, vector<4x1xf32>
    %c4_21 = arith.constant 4 : index
    %c97 = arith.constant 97 : index
    %51 = vector.load %arg1[%c4_21, %c97] : memref<8x768xf32, #tpu.memory_space<vmem>>, vector<4x1xf32>
    %52 = vector.broadcast %44 : f32 to vector<4x1xf32>
    %53 = arith.mulf %52, %50 : vector<4x1xf32>
    %54 = arith.subf %43, %53 : vector<4x1xf32>
    %55 = vector.broadcast %49 : f32 to vector<4x1xf32>
    %56 = arith.mulf %55, %54 : vector<4x1xf32>
    %57 = arith.addf %56, %51 : vector<4x1xf32>
    %58 = math.tanh %57 : vector<4x1xf32>
    %cst_22 = arith.constant 2.500000e+00 : f32
    %59 = vector.broadcast %cst_22 : f32 to vector<4x1xf32>
    %60 = arith.mulf %58, %59 : vector<4x1xf32>
    %61 = vector.shape_cast %60 : vector<4x1xf32> to vector<4x1xf32>
    %62 = vector.broadcast %61 : vector<4x1xf32> to vector<4x128xf32>
    %c0_23 = arith.constant 0 : index
    %c0_24 = arith.constant 0 : index
    %63 = vector.load %arg3[%c0_23, %c0_24] : memref<4x128xf32, #tpu.memory_space<vmem>>, vector<4x128xf32>
    tpu.vector_store %arg3[%c0_23, %c0_24], %62 {strides = array<i32>} : memref<4x128xf32, #tpu.memory_space<vmem>>, vector<4x128xf32>,
    return
  }
}

</mosaic_0001>

<bundles_post_ra>
// kernel: pooled_audio_head.1
= control target key start
LH: loop header
LB: loop body
LE: loop exit
PB: predicated region body
PF: predicated region fallthrough
CT: control target
= control target key end

     0   :  { %vm362_vm0 = vcmask 1043456   ;;  %s735_s10 = smov 96   ;;  %vm440_vm1 = vcmask 257024   ;;  %s736_s30 = smov 64   ;;  %s1121_s2 = inlined_call_operand.vmem [shape: f32[768,32], index: 2, kind: input, shape index: {}]   ;;  %s1122_s0 = inlined_call_operand.vmem [shape: f32[4,768], index: 0, kind: input, shape index: {}]   ;;  %s1123_s1 = inlined_call_operand.vmem [shape: f32[8,768], index: 1, kind: input, shape index: {}]   ;;  %s1124_s3 = inlined_call_operand.vmem [shape: f32[4,128], index: 3, kind: output, shape index: {}]  }
   0x1   :  { %v54_v0 = vld [vmem:[%s1121_s2 + $0x80] sm:$0xff]  ;;  %v55_v1 = vld [vmem:[%s1121_s2 + $0x88] sm:$0xff]  ;;  %v56_v5 = vld [vmem:[%s1121_s2 + $0x90] sm:$0xff]  ;;  %s738_s11 = smov 31  }
   0x2   :  { %v38_v2 = vld [vmem:[%s1121_s2] sm:$0xff]  ;;  %v608_v3 = vpack.c.bf16 %v55_v1, %v54_v0  ;;  %v39_v4 = vld [vmem:[%s1121_s2 + $0x8] sm:$0xff]  ;;  %v57_v6 = vld [vmem:[%s1121_s2 + $0x98] sm:$0xff] }
   0x3   :  { %v610_v7 = vpack.c.bf16 %v39_v4, %v38_v2  ;;  %v612_v8 = vpack.c.bf16 %v57_v6, %v56_v5  ;;  %v40_v9 = vld [vmem:[%s1121_s2 + $0x10] sm:$0xff]  ;;  %v41_v10 = vld [vmem:[%s1121_s2 + $0x18] sm:$0xff]  ;;  %v58_v11 = vld [vmem:[%s1121_s2 + $0xa0] sm:$0xff] }
   0x4   :  { %609 = vmatprep.subr.bf16.mxu0 %v608_v3  ;;  %v59_v12 = vld [vmem:[%s1121_s2 + $0xa8] sm:$0xff]  ;;  %v42_v13 = vld [vmem:[%s1121_s2 + $0x20] sm:$0xff]  ;;  %v614_v15 = vpack.c.bf16 %v41_v10, %v40_v9  ;;  %v815_v22 = vld [vmem:[%s1122_s0 + $0x10] sm:$0xff] }
   0x5   :  { %v43_v14 = vld [vmem:[%s1121_s2 + $0x28] sm:$0xff]  ;;  %611 = vmatpush3.bf16.msra.mxu0 %v610_v7  ;;  %v616_v16 = vpack.c.bf16 %v59_v12, %v58_v11  ;;  %v86_v17 = vld [vmem:[%s1121_s2 + $0x180] sm:$0xff]  ;;  %v60_v25 = vld [vmem:[%s1121_s2 + $0xb0] sm:$0xff]  ;;  %v358_v28 = vcombine.high %v815_v22, %v815_v22  ;;  %v385_v46 = vmul.f32 %v815_v22, %v815_v22  ;;  %v370_v53 = vsel %vm362_vm0, %v815_v22, 0.0 }
   0x6   :  { %v87_v18 = vld [vmem:[%s1121_s2 + $0x188] sm:$0xff]  ;;  %v805_v19 = vld [vmem:[%s1122_s0] sm:$0xff]  ;;  %613 = vmatprep.subr.bf16.mxu0 %v612_v8  ;;  %v61_v29 = vld [vmem:[%s1121_s2 + $0xb8] sm:$0xff]  ;;  %v618_v38 = vpack.c.bf16 %v43_v14, %v42_v13 }
   0x7   :  { %v640_v20 = vpack.c.bf16 %v87_v18, %v86_v17  ;;  %v810_v21 = vld [vmem:[%s1122_s0 + $0x8] sm:$0xff]  ;;  %v356_v23 = vcombine.high %v805_v19, %v805_v19  ;;  %v363_v24 = vsel %vm362_vm0, %v805_v19, 0.0  ;;  %v383_v26 = vmul.f32 %v805_v19, %v805_v19  ;;  %v70_v30 = vld [vmem:[%s1121_s2 + $0x100] sm:$0xff]  ;;  %v44_v35 = vld [vmem:[%s1121_s2 + $0x30] sm:$0xff] }
   0x8   :  { %v357_v27 = vcombine.high %v810_v21, %v810_v21  ;;  %v71_v31 = vld [vmem:[%s1121_s2 + $0x108] sm:$0xff]  ;;  %v366_v33 = vsel %vm362_vm0, %v810_v21, 0.0  ;;  %v88_v36 = vld [vmem:[%s1121_s2 + $0x190] sm:$0xff]  ;;  %v384_v37 = vmul.f32 %v810_v21, %v810_v21  ;;  %v620_v41 = vpack.c.bf16 %v61_v29, %v60_v25  ;;  %v45_v42 = vld [vmem:[%s1121_s2 + $0x38] sm:$0xff] }
   0x9   :  { %641 = vmatprep.subr.bf16.mxu1 %v640_v20  ;;  %v364_v32 = vsel %vm362_vm0, %v356_v23, 0.0  ;;  %v642_v34 = vpack.c.bf16 %v71_v31, %v70_v30  ;;  %615 = vmatpush3.bf16.msra.mxu0 %v614_v15  ;;  %v89_v43 = vld [vmem:[%s1121_s2 + $0x198] sm:$0xff]  ;;  %v62_v44 = vld [vmem:[%s1121_s2 + $0xc0] sm:$0xff]  ;;  %v389_v47 = vcombine.high %v383_v26, %v383_v26  ;;  %v395_v48 = vsel %vm362_vm0, %v383_v26, 0.0  ;;  %v63_v49 = vld [vmem:[%s1121_s2 + $0xc8] sm:$0xff] }
   0xa   :  { %v365_v39 = vadd.f32 %v364_v32, %v363_v24  ;;  %v368_v40 = vsel %vm362_vm0, %v357_v27, 0.0  ;;  %617 = vmatprep.subr.bf16.mxu0 %v616_v16  ;;  %v644_v45 = vpack.c.bf16 %v89_v43, %v88_v36  ;;  %v72_v50 = vld [vmem:[%s1121_s2 + $0x110] sm:$0xff]  ;;  %v73_v51 = vld [vmem:[%s1121_s2 + $0x118] sm:$0xff]  ;;  %v390_v54 = vcombine.high %v384_v37, %v384_v37  ;;  %v90_v55 = vld [vmem:[%s1121_s2 + $0x1a0] sm:$0xff] }
   0xb   :  { %643 = vmatpush3.bf16.msra.mxu1 %v642_v34  ;;  %v91_v56 = vld [vmem:[%s1121_s2 + $0x1a8] sm:$0xff]  ;;  %v372_v57 = vsel %vm362_vm0, %v358_v28, 0.0  ;;  %v396_v58 = vsel %vm362_vm0, %v389_v47, 0.0  ;;  %v398_v59 = vsel %vm362_vm0, %v384_v37, 0.0  ;;  %v646_v60 = vpack.c.bf16 %v73_v51, %v72_v50  ;;  %v74_v61 = vld [vmem:[%s1121_s2 + $0x120] sm:$0xff]  ;;  %v64_v8 = vld [vmem:[%s1121_s2 + $0xd0] sm:$0xff] }
   0xc   :  { %v367_v52 = vadd.f32 %v366_v33, %v365_v39  ;;  %645 = vmatprep.subr.bf16.mxu1 %v644_v45  ;;  %v622_v63 = vpack.c.bf16 %v45_v42, %v44_v35  ;;  %v397_v0 = vadd.f32 %v396_v58, %v395_v48  ;;  %v624_v1 = vpack.c.bf16 %v63_v49, %v62_v44  ;;  %v46_v2 = vld [vmem:[%s1121_s2 + $0x40] sm:$0xff]  ;;  %v47_v3 = vld [vmem:[%s1121_s2 + $0x48] sm:$0xff]  ;;  %v92_v10 = vld [vmem:[%s1121_s2 + $0x1b0] sm:$0xff] }
   0xd   :  { %619 = vmatpush3.bf16.msra.mxu0 %v618_v38  ;;  %v75_v4 = vld [vmem:[%s1121_s2 + $0x128] sm:$0xff]  ;;  %v391_v5 = vcombine.high %v385_v46, %v385_v46  ;;  %v400_v6 = vsel %vm362_vm0, %v390_v54, 0.0  ;;  %v648_v7 = vpack.c.bf16 %v91_v56, %v90_v55  ;;  %v93_v11 = vld [vmem:[%s1121_s2 + $0x1b8] sm:$0xff]  ;;  %v76_v16 = vld [vmem:[%s1121_s2 + $0x130] sm:$0xff]  ;;  %v402_v18 = vsel %vm362_vm0, %v385_v46, 0.0 }
   0xe   :  { %v369_v62 = vadd.f32 %v368_v40, %v367_v52  ;;  %621 = vmatprep.subr.bf16.mxu0 %v620_v41  ;;  %v650_v9 = vpack.c.bf16 %v75_v4, %v74_v61  ;;  %v399_v13 = vadd.f32 %v398_v59, %v397_v0  ;;  %v65_v14 = vld [vmem:[%s1121_s2 + $0xd8] sm:$0xff]  ;;  %v652_v15 = vpack.c.bf16 %v93_v11, %v92_v10  ;;  %v94_v20 = vld [vmem:[%s1121_s2 + $0x1c0] sm:$0xff]  ;;  %v48_v26 = vld [vmem:[%s1121_s2 + $0x50] sm:$0xff] }
   0xf   :  { %647 = vmatpush3.bf16.msra.mxu1 %v646_v60  ;;  %v77_v17 = vld [vmem:[%s1121_s2 + $0x138] sm:$0xff]  ;;  %v626_v25 = vpack.c.bf16 %v47_v3, %v46_v2  ;;  %v95_v28 = vld [vmem:[%s1121_s2 + $0x1c8] sm:$0xff]  ;;  %v404_v29 = vsel %vm362_vm0, %v391_v5, 0.0  ;;  %v628_v30 = vpack.c.bf16 %v65_v14, %v64_v8  ;;  %v66_v31 = vld [vmem:[%s1121_s2 + $0xe0] sm:$0xff] }
  0x10   :  { %v371_v12 = vadd.f32 %v370_v53, %v369_v62  ;;  %649 = vmatprep.subr.bf16.mxu1 %v648_v7  ;;  %v401_v24 = vadd.f32 %v400_v6, %v399_v13  ;;  %v49_v27 = vld [vmem:[%s1121_s2 + $0x58] sm:$0xff]  ;;  %v67_v32 = vld [vmem:[%s1121_s2 + $0xe8] sm:$0xff]  ;;  %v654_v33 = vpack.c.bf16 %v77_v17, %v76_v16  ;;  %v78_v34 = vld [vmem:[%s1121_s2 + $0x140] sm:$0xff]  ;;  %v656_v36 = vpack.c.bf16 %v95_v28, %v94_v20 }
  0x11   :  { %623 = vmatpush3.bf16.msra.mxu0 %v622_v63  ;;  %v79_v37 = vld [vmem:[%s1121_s2 + $0x148] sm:$0xff]  ;;  %v96_v38 = vld [vmem:[%s1121_s2 + $0x1d0] sm:$0xff]  ;;  %v97_v39 = vld [vmem:[%s1121_s2 + $0x1d8] sm:$0xff]  ;;  %v630_v42 = vpack.c.bf16 %v49_v27, %v48_v26  ;;  %v632_v43 = vpack.c.bf16 %v67_v32, %v66_v31 }
  0x12   :  { %v373_v23 = vadd.f32 %v372_v57, %v371_v12  ;;  %625 = vmatprep.subr.bf16.mxu0 %v624_v1  ;;  %v403_v35 = vadd.f32 %v402_v18, %v401_v24  ;;  %v726_v40 = vld [vmem:[%s1123_s1] ss:$8 sps:$4 sm:$0xff]   ;;  %v68_v46 = vld [vmem:[%s1121_s2 + $0xf0] sm:$0xff]  ;;  %v658_v47 = vpack.c.bf16 %v79_v37, %v78_v34  ;;  %v69_v49 = vld [vmem:[%s1121_s2 + $0xf8] sm:$0xff]  ;;  %v660_v50 = vpack.c.bf16 %v97_v39, %v96_v38 }
  0x13   :  { %651 = vmatpush3.bf16.msra.mxu1 %v650_v9  ;;  %v50_v44 = vld [vmem:[%s1121_s2 + $0x60] sm:$0xff]  ;;  %v51_v45 = vld [vmem:[%s1121_s2 + $0x68] sm:$0xff]  ;;  %v35_v48 = vmul.f32 %v726_v40, %v805_v19  ;;  %v80_v51 = vld [vmem:[%s1121_s2 + $0x150] sm:$0xff]  ;;  %v636_v57 = vpack.c.bf16 %v69_v49, %v68_v46 }
  0x14   :  { %374 = vadd.xlane.f32.xlu0 %v373_v23  ;;  %653 = vmatprep.subr.bf16.mxu1 %v652_v15  ;;  %v405_v41 = vadd.f32 %v404_v29, %v403_v35  ;;  %v81_v52 = vld [vmem:[%s1121_s2 + $0x158] sm:$0xff]  ;;  %v98_v19 = vld [vmem:[%s1121_s2 + $0x1e0] sm:$0xff]  ;;  %v99_v54 = vld [vmem:[%s1121_s2 + $0x1e8] sm:$0xff]  ;;  %v634_v55 = vpack.c.bf16 %v51_v45, %v50_v44 }
  0x15   :  { %627 = vmatpush3.bf16.msra.mxu0 %v626_v25  ;;  %v137_v53 = vcombine.high %v35_v48, %v35_v48  ;;  %v52_v56 = vld [vmem:[%s1121_s2 + $0x70] sm:$0xff]  ;;  %v53_v58 = vld [vmem:[%s1121_s2 + $0x78] sm:$0xff]  ;;  %v662_v59 = vpack.c.bf16 %v81_v52, %v80_v51  ;;  %v118_v60 = vld [vmem:[%s1121_s2 + $0x280] sm:$0xff]  ;;  %v664_v62 = vpack.c.bf16 %v99_v54, %v98_v19 }
  0x16   :  { %629 = vmatprep.subr.bf16.mxu0 %v628_v30  ;;  %v119_v61 = vld [vmem:[%s1121_s2 + $0x288] sm:$0xff]  ;;  %v82_v63 = vld [vmem:[%s1121_s2 + $0x160] sm:$0xff]  ;;  %v100_v1 = vld [vmem:[%s1121_s2 + $0x1f0] sm:$0xff]  ;;  %v638_v3 = vpack.c.bf16 %v53_v58, %v52_v56 }
  0x17   :  { %655 = vmatpush3.bf16.msra.mxu1 %v654_v33  ;;  %207 = vmatprep.mubr.f32.mxu0 %v137_v53  ;;  %v83_v0 = vld [vmem:[%s1121_s2 + $0x168] sm:$0xff]  ;;  %v101_v2 = vld [vmem:[%s1121_s2 + $0x1f8] sm:$0xff]  ;;  %v672_v5 = vpack.c.bf16 %v119_v61, %v118_v60  ;;  %v102_v6 = vld [vmem:[%s1121_s2 + $0x200] sm:$0xff] }
  0x18   :  { %406 = vadd.xlane.f32.xlu0 %v405_v41  ;;  %657 = vmatprep.subr.bf16.mxu1 %v656_v36  ;;  %v727_v4 = vld [vmem:[%s1123_s1 + $0x10] ss:$8 sps:$4 sm:$0xff]   ;;  %v103_v7 = vld [vmem:[%s1121_s2 + $0x208] sm:$0xff]  ;;  %v666_v8 = vpack.c.bf16 %v83_v0, %v82_v63  ;;  %v668_v11 = vpack.c.bf16 %v101_v2, %v100_v1  ;;  %v106_v28 = vld [vmem:[%s1121_s2 + $0x220] sm:$0xff] }
  0x19   :  { %631 = vmatpush3.bf16.msra.mxu0 %v630_v42  ;;  %v120_v9 = vld [vmem:[%s1121_s2 + $0x290] sm:$0xff]  ;;  %v121_v10 = vld [vmem:[%s1121_s2 + $0x298] sm:$0xff]  ;;  %v36_v14 = vmul.f32 %v727_v4, %v810_v21  ;;  %v674_v15 = vpack.c.bf16 %v103_v7, %v102_v6  ;;  %v122_v21 = vld [vmem:[%s1121_s2 + $0x2a0] sm:$0xff] }
  0x1a   :  { %633 = vmatprep.subr.bf16.mxu0 %v632_v43  ;;  %v84_v12 = vld [vmem:[%s1121_s2 + $0x170] sm:$0xff]  ;;  %v85_v13 = vld [vmem:[%s1121_s2 + $0x178] sm:$0xff]  ;;  %v676_v17 = vpack.c.bf16 %v121_v10, %v120_v9  ;;  %v123_v24 = vld [vmem:[%s1121_s2 + $0x2a8] sm:$0xff] }
  0x1b   :  { %659 = vmatpush3.bf16.msra.mxu1 %v658_v47  ;;  %v138_v16 = vcombine.high %v36_v14, %v36_v14  ;;  %v104_v18 = vld [vmem:[%s1121_s2 + $0x210] sm:$0xff]  ;;  %v105_v20 = vld [vmem:[%s1121_s2 + $0x218] sm:$0xff]  ;;  %v670_v23 = vpack.c.bf16 %v85_v13, %v84_v12  ;;  %v728_v25 = vld [vmem:[%s1123_s1 + $0x20] ss:$8 sps:$4 sm:$0xff]   ;;  %v680_v27 = vpack.c.bf16 %v123_v24, %v122_v21 }
  0x1c   :  { %661 = vmatprep.subr.bf16.mxu1 %v660_v50  ;;  %v678_v26 = vpack.c.bf16 %v105_v20, %v104_v18  ;;  %v107_v29 = vld [vmem:[%s1121_s2 + $0x228] sm:$0xff]  ;;  %v37_v30 = vmul.f32 %v728_v25, %v815_v22  ;;  %v124_v31 = vld [vmem:[%s1121_s2 + $0x2b0] sm:$0xff]  ;;  %v125_v32 = vld [vmem:[%s1121_s2 + $0x2b8] sm:$0xff] }
  0x1d   :  { %635 = vmatpush3.bf16.msra.mxu0 %v634_v55  ;;  %277 = vmatprep.mubr.f32.mxu1 %v138_v16  ;;  %v682_v34 = vpack.c.bf16 %v107_v29, %v106_v28  ;;  %v684_v35 = vpack.c.bf16 %v125_v32, %v124_v31  ;;  %v108_v36 = vld [vmem:[%s1121_s2 + $0x230] sm:$0xff]  ;;  %v109_v22 = vld [vmem:[%s1121_s2 + $0x238] sm:$0xff]  ;;  %v126_v37 = vld [vmem:[%s1121_s2 + $0x2c0] sm:$0xff] }
  0x1e   :  { %637 = vmatprep.subr.bf16.mxu0 %v636_v57  ;;  %v139_v33 = vcombine.high %v37_v30, %v37_v30  ;;  %v127_v38 = vld [vmem:[%s1121_s2 + $0x2c8] sm:$0xff]  ;;  %v686_v39 = vpack.c.bf16 %v109_v22, %v108_v36  ;;  %v110_v41 = vld [vmem:[%s1121_s2 + $0x240] sm:$0xff]  ;;  %v128_v43 = vld [vmem:[%s1121_s2 + $0x2d0] sm:$0xff] }
  0x1f   :  { %663 = vmatpush3.bf16.msra.mxu1 %v662_v59  ;;  %v688_v40 = vpack.c.bf16 %v127_v38, %v126_v37  ;;  %v111_v42 = vld [vmem:[%s1121_s2 + $0x248] sm:$0xff]  ;;  %v129_v44 = vld [vmem:[%s1121_s2 + $0x2d8] sm:$0xff]  ;;  %v1075_v46 = vld [vmem:[%s1123_s1] sm:$0xf0] }
  0x20   :  { %665 = vmatprep.subr.bf16.mxu1 %v664_v62  ;;  %v690_v45 = vpack.c.bf16 %v111_v42, %v110_v41  ;;  %v692_v47 = vpack.c.bf16 %v129_v44, %v128_v43  ;;  %v113_v49 = vld [vmem:[%s1121_s2 + $0x258] sm:$0xff]  ;;  %v1084_v50 = vrot.slane %v1075_v46, 4  ;;  %v130_v51 = vld [vmem:[%s1121_s2 + $0x2e0] sm:$0xff]  ;;  %v131_v52 = vld [vmem:[%s1121_s2 + $0x2e8] sm:$0xff] }
  0x21   :  { %639 = vmatpush3.bf16.msra.mxu0 %v638_v3  ;;  %v696_v19 = vpack.c.bf16 %v131_v52, %v130_v51  ;;  %v114_v54 = vld [vmem:[%s1121_s2 + $0x260] sm:$0xff]  ;;  %v115_v55 = vld [vmem:[%s1121_s2 + $0x268] sm:$0xff]  ;;  %v132_v56 = vld [vmem:[%s1121_s2 + $0x2f0] sm:$0xff] }
  0x22   :  { %673 = vmatprep.subr.bf16.mxu0 %v672_v5  ;;  %435 = vrot.lane.b32.xlu1 %v1084_v50, %s735_s10  ;;  %v133_v57 = vld [vmem:[%s1121_s2 + $0x2f8] sm:$0xff]  ;;  %v698_v58 = vpack.c.bf16 %v115_v55, %v114_v54  ;;  %v116_v60 = vld [vmem:[%s1121_s2 + $0x270] sm:$0xff]  ;;  %s737_s10 = smov 32  }
  0x23   :  { %667 = vmatpush3.bf16.msra.mxu1 %v666_v8  ;;  %v700_v59 = vpack.c.bf16 %v133_v57, %v132_v56  ;;  %v117_v61 = vld [vmem:[%s1121_s2 + $0x278] sm:$0xff] }
  0x24   :  { %669 = vmatprep.subr.bf16.mxu1 %v668_v11  ;;  %208 = vmatmul.mubr.f32.vlgmr.msra.gmra.mrb[0].mxu0 %v35_v48  ;;  %v112_v48 = vld [vmem:[%s1121_s2 + $0x250] sm:$0xff]  ;;  %v702_v62 = vpack.c.bf16 %v117_v61, %v116_v60  ;;  %v739_v61 = vmov 0  }
  0x25   :  { %675 = vmatpush3.bf16.msra.mxu0 %v674_v15  ;;  %347 = vmatprep.mubr.f32.mxu0 %v139_v33  ;;  %v694_v53 = vpack.c.bf16 %v113_v49, %v112_v48 }
  0x26   :  { %677 = vmatprep.subr.bf16.mxu0 %v676_v17  ;;  %721 = vset.pattern.permute.xlu1 %v739_v61 }
  0x27   :  { %671 = vmatpush3.bf16.msra.mxu1 %v670_v23  ;;  %722 = vset.pattern.permute.xlu0 %v739_v61 }
  0x29   :  { %679 = vmatpush3.bf16.msra.mxu0 %v678_v26 }
  0x2a   :  { %278 = vmatmul.mubr.f32.vlgmr.msra.gmra.mrb[0].mxu1 %v36_v14  ;;  %681 = vmatprep.subr.bf16.mxu0 %v680_v27 }
  0x2d   :  { %683 = vmatpush3.bf16.msra.mxu0 %v682_v34 }
  0x2e   :  { %685 = vmatprep.subr.bf16.mxu0 %v684_v35 }
  0x31   :  { %687 = vmatpush3.bf16.msra.mxu0 %v686_v39 }
  0x32   :  { %689 = vmatprep.subr.bf16.mxu0 %v688_v40 }
  0x35   :  { %691 = vmatpush3.bf16.msra.mxu0 %v690_v45 }
  0x36   :  { %693 = vmatprep.subr.bf16.mxu0 %v692_v47 }
  0x39   :  { %695 = vmatpush3.bf16.msra.mxu0 %v694_v53 }
  0x3a   :  { %697 = vmatprep.subr.bf16.mxu0 %v696_v19 }
  0x3d   :  { %699 = vmatpush3.bf16.msra.mxu0 %v698_v58 }
  0x3e   :  { %701 = vmatprep.subr.bf16.mxu0 %v700_v59 }
  0x41   :  { %703 = vmatpush3.bf16.msra.mxu0 %v702_v62 }
  0x44   :  { %348 = vmatmul.mubr.f32.vlgmr.msra.gmra.mrb[2].mxu0 %v37_v30 }
  0x94   :  { %v436_v33 = vpop.permute.xlu1 %435 }
  0xa1   :  { %v375_v63 = vpop.xlane.xlu0 %374 }
  0xa2   :  { %v376_v0 = vrot.slane %v375_v63, 4 }
  0xa4   :  { %v377_v1 = vadd.f32 %v376_v0, %v375_v63 }
  0xa5   :  { %v407_v2 = vpop.xlane.xlu0 %406 }
  0xa6   :  { %v378_v3 = vrot.slane %v377_v1, 2  ;;  %v408_v4 = vrot.slane %v407_v2, 4 }
  0xa8   :  { %v409_v5 = vadd.f32 %v408_v4, %v407_v2  ;;  %v379_v6 = vadd.f32 %v378_v3, %v377_v1 }
  0xaa   :  { %v410_v7 = vrot.slane %v409_v5, 2  ;;  %v380_v8 = vrot.slane %v379_v6, 1 }
  0xac   :  { %v381_v9 = vadd.f32 %v380_v8, %v379_v6  ;;  %v411_v10 = vadd.f32 %v410_v7, %v409_v5 }
  0xae   :  { %704 = vpush %v381_v9  ;;  %v412_v11 = vrot.slane %v411_v10, 1 }
  0xb0   :  { %v413_v12 = vadd.f32 %v412_v11, %v411_v10 }
  0xb2   :  { %706 = vpush %v413_v12 }
  0xdf   :  { %s705_s2 = spop %704 }
  0xe0   :  { %s415_s22 = smul.f32 0.00016276042, %s705_s2 }
  0xe2   :  { %s417_s23 = smul.f32 %s415_s22, %s415_s22 }
  0xe3   :  { %s707_s24 = spop %706 }
  0xe4   :  { %s416_s25 = smul.f32 0.00016276042, %s707_s24 }
  0xe6   :  { %s418_s26 = ssub.f32 %s416_s25, %s417_s23 }
  0xe8   :  { %s419_s27 = sadd.f32 1e-05, %s418_s26 }
  0xea   :  { %v420_v13 = vstv %s419_s27 }
  0xeb   :  { %729 = vrsqrt.f32 %v420_v13 }
  0xf5   :  { %v730_v14 = vpop.eup %729 }
  0xf6   :  { %708 = vpush %v730_v14 }
  0xf7   :  { %v535_v15 = vpop.f32.mrb[0].mxu0 }
  0xf8   :  { %v536_v16 = vpop.f32.mrb[1].mxu0 }
  0xf9   :  { %v537_v17 = vadd.f32 %v536_v16, %v535_v15 }
  0xfd   :  { %v570_v18 = vpop.f32.mrb[0].mxu1 }
  0xfe   :  { %v571_v20 = vpop.f32.mrb[1].mxu1 }
  0xff   :  { %v572_v23 = vadd.f32 %v571_v20, %v570_v18 }
 0x101   :  { %v280_v21 = vadd.f32 %v572_v23, %v537_v17 }
 0x117   :  { %v605_v24 = vpop.f32.mrb[2].mxu0 }
 0x118   :  { %v606_v25 = vpop.f32.mrb[3].mxu0 }
 0x119   :  { %v607_v26 = vadd.f32 %v606_v25, %v605_v24 }
 0x11b   :  { %v350_v27 = vadd.f32 %v607_v26, %v280_v21 }
 0x127   :  { %s709_s28 = spop %708 }
 0x128   :  { %s426_s29 = smul.f32 %s709_s28, %s415_s22  ;;  %v424_v28 = vstv %s709_s28 }
 0x129   :  { %v425_v31 = vmul.f32 %v424_v28, %v350_v27 }
 0x12a   :  { %v427_v29 = vstv %s426_s29 }
 0x12b   :  { %v428_v30 = vmul.f32 %v427_v29, %v1075_v46 }
 0x12d   :  { %v430_v32 = vrot.slane %v428_v30, 4 }
 0x12f   :  { %v432_v34 = vsub.f32 %v425_v31, %v430_v32 }
 0x131   :  { %v438_v35 = vadd.f32 %v436_v33, %v432_v34 }
 0x133   :  { %v439_v36 = vmax.f32 %v438_v35, 0.0 }
 0x135   :  { %v441_v22 = vsel %vm440_vm1, %v439_v36, 0.0  ;;  %v451_v37 = vmul.f32 %v439_v36, %v439_v36 }
 0x136   :  { %442 = vadd.xlane.f32.xlu1 %v441_v22 }
 0x137   :  { %v452_v38 = vsel %vm440_vm1, %v451_v37, 0.0 }
 0x138   :  { %453 = vadd.xlane.f32.xlu0 %v452_v38 }
 0x14e   :  { %462 = vrot.lane.b32.xlu0 %v1084_v50, %s736_s30 }
 0x1c3   :  { %v443_v39 = vpop.xlane.xlu1 %442 }
 0x1c4   :  { %v444_v40 = vrot.slane %v443_v39, 4 }
 0x1c5   :  { %v454_v41 = vpop.xlane.xlu0 %453 }
 0x1c6   :  { %v445_v42 = vadd.f32 %v444_v40, %v443_v39  ;;  %v455_v43 = vrot.slane %v454_v41, 4 }
 0x1c8   :  { %v446_v44 = vrot.slane %v445_v42, 2  ;;  %v456_v45 = vadd.f32 %v455_v43, %v454_v41 }
 0x1c9   :  { %v463_v47 = vpop.permute.xlu0 %462 }
 0x1ca   :  { %v457_v48 = vrot.slane %v456_v45, 2  ;;  %v465_v49 = vmul.f32 %v463_v47, %v439_v36  ;;  %v447_v51 = vadd.f32 %v446_v44, %v445_v42 }
 0x1cc   :  { %v466_v52 = vsel %vm440_vm1, %v465_v49, 0.0  ;;  %v448_v53 = vrot.slane %v447_v51, 1  ;;  %v458_v19 = vadd.f32 %v457_v48, %v456_v45 }
 0x1cd   :  { %467 = vadd.xlane.f32.xlu0 %v466_v52 }
 0x1ce   :  { %v449_v54 = vadd.f32 %v448_v53, %v447_v51  ;;  %v459_v55 = vrot.slane %v458_v19, 1 }
 0x1d0   :  { %710 = vpush %v449_v54  ;;  %v460_v56 = vadd.f32 %v459_v55, %v458_v19 }
 0x1d2   :  { %712 = vpush %v460_v56 }
 0x201   :  { %s711_s4 = spop %710 }
 0x202   :  { %s469_s5 = smul.f32 0.0078125, %s711_s4 }
 0x203   :  { %s713_s6 = spop %712 }
 0x204   :  { %s471_s7 = smul.f32 %s469_s5, %s469_s5  ;;  %v477_v57 = vstv %s469_s5 }
 0x205   :  { %v478_v58 = vmul.f32 %v477_v57, %v1075_v46  ;;  %s470_s8 = smul.f32 0.0078125, %s713_s6 }
 0x207   :  { %s472_s9 = ssub.f32 %s470_s8, %s471_s7  ;;  %v480_v59 = vrot.slane %v478_v58, 4 }
 0x209   :  { %s473_s1 = sadd.f32 1e-05, %s472_s9  ;;  %481 = vrot.lane.b32.xlu1 %v480_v59, %s737_s10 }
 0x20b   :  { %v474_v60 = vstv %s473_s1 }
 0x20c   :  { %731 = vrsqrt.f32 %v474_v60 }
 0x20d   :  { %487 = vrot.lane.b32.xlu1 %v1084_v50, %s738_s11 }
 0x216   :  { %v732_v62 = vpop.eup %731 }
 0x217   :  { %714 = vpush %v732_v62 }
 0x248   :  { %s715_s12 = spop %714 }
 0x249   :  { %v485_v1 = vstv %s715_s12 }
 0x25a   :  { %v468_v63 = vpop.xlane.xlu0 %467 }
 0x27b   :  { %v482_v0 = vpop.permute.xlu1 %481 }
 0x27c   :  { %v484_v46 = vsub.f32 %v468_v63, %v482_v0 }
 0x27e   :  { %v486_v2 = vmul.f32 %v485_v1, %v484_v46 }
 0x27f   :  { %v488_v3 = vpop.permute.xlu1 %487 }
 0x280   :  { %v490_v4 = vadd.f32 %v488_v3, %v486_v2 }
 0x282   :  { %733 = vtanh.f32 %v490_v4 }
 0x28c   :  { %v734_v5 = vpop.eup %733 }
 0x28d   :  { %v492_v6 = vmul.f32 2.5, %v734_v5 }
 0x28f   :  { %495 = vperm.xlu1 %721, %v492_v6  }
 0x30e   :  { %v496_v7 = vpop.permute.xlu1 %495 }
 0x30f   :  { %498 = vst [vmem:[%s1124_s3] sm:$0xf] %v496_v7 }

</bundles_post_ra>
